<compile_context>
chip_gen: v6e
topology: v6e:2x2x1
jax: 0.10.0
libtpu: 0.0.40
codegen_flags: <defaults>
</compile_context>

<pallas_src>
from functools import partial

import jax
import jax.numpy as jnp
from jax.experimental import pallas as pl
from jax.experimental.pallas import tpu as pltpu


def _round_up(n, m):
    return ((n + m - 1) // m) * m


def nn_layer_kernel(x_ref, w_ref, gamma_ref, beta_ref, o_ref, *, eps, tk, x_full_k):
    """One (feature-tile j, K-tile k) grid step.

    o_ref is the f32 output block, resident across the k (reduction) axis, and
    doubles as the matmul accumulator (saves an (N, tn) VMEM scratch plus the
    final full-tile copy).
    """
    k = pl.program_id(1)

    @pl.when(k == 0)
    def _init():
        o_ref[...] = jnp.zeros_like(o_ref)

    if x_full_k:
        # x block holds the full padded K axis -> its BlockSpec index is
        # constant, so it is DMA'd from HBM exactly once for the whole kernel;
        # slice the current K tile straight out of VMEM.
        kk = pl.multiple_of(k * tk, 128)
        x = x_ref[:, pl.ds(kk, tk)]
    else:
        x = x_ref[...]

    o_ref[...] += jnp.dot(x, w_ref[...], preferred_element_type=jnp.float32)

    @pl.when(k == pl.num_programs(1) - 1)
    def _epilogue():
        y = o_ref[...]                                     # (N, tn) f32
        mean = jnp.mean(y, axis=0, keepdims=True)          # (1, tn)
        centered = y - mean                                # reused for var + output
        var = jnp.mean(centered * centered, axis=0, keepdims=True)
        scale = gamma_ref[...] * jax.lax.rsqrt(var + eps)  # (1, tn), rsqrt on EUP
        o_ref[...] = jnp.maximum(centered * scale + beta_ref[...], 0.0)


def prepare_nn_layer_params(w, gamma, beta, *, b=None, tn=512, tk=512,
                            matmul_dtype=jnp.bfloat16):
    """Pad + cast the layer parameters ONCE, outside the per-call hot path.

    w:     (inp, out)  -- nn.Linear weight pre-transposed to (in, out).
    gamma: (out,) or (1, out) BatchNorm1d weight.
    beta:  (out,) or (1, out) BatchNorm1d bias.
    b:     optional Linear bias -- accepted for API parity but NOT used:
           training-mode BatchNorm subtracts the per-feature batch mean, which
           cancels a per-feature bias exactly.
    """
    del b  # mathematically dead under training-mode BatchNorm
    inp, out = w.shape

    out128 = _round_up(out, 128)
    tn = min(tn, out128)
    # Keep >= 2 feature tiles when the layer is wide enough so v7x's two
    # TensorCores both get work under dimension_semantics=("parallel", ...).
    if out128 >= 256 and _round_up(out, tn) // tn < 2:
        tn = max(128, ((out128 // 2) // 128) * 128)
    tk = min(tk, _round_up(inp, 128))

    inp_p = _round_up(inp, tk)
    out_p = _round_up(out, tn)

    w = jnp.asarray(w, jnp.float32)
    gamma = jnp.reshape(jnp.asarray(gamma, jnp.float32), (1, out))
    beta = jnp.reshape(jnp.asarray(beta, jnp.float32), (1, out))
    if inp_p != inp or out_p != out:
        # Lane-dense padding: padded x columns / w rows contribute 0 to the
        # matmul, padded output columns are sliced off in the wrapper.
        w = jnp.pad(w, ((0, inp_p - inp), (0, out_p - out)))
        gamma = jnp.pad(gamma, ((0, 0), (0, out_p - out)))
        beta = jnp.pad(beta, ((0, 0), (0, out_p - out)))

    # bf16 weight feed: halves the dominant HBM->VMEM DMA traffic and matches
    # the MXU's native dtype on v5e/v6e/v7x; BN math stays f32 in the kernel.
    w = w.astype(matmul_dtype)

    return dict(w=w, gamma=gamma, beta=beta, inp=inp, out=out,
                inp_p=inp_p, out_p=out_p, tn=tn, tk=tk,
                matmul_dtype=jnp.dtype(matmul_dtype))


def nn_layer(x, params, *, eps=1e-5):
    """Forward of NN_layer: Linear -> BatchNorm1d (training batch stats) -> ReLU.

    x: (N, inp) float32; N must be a multiple of 8 (TPU sublanes; multiples of
    16 preferred for the bf16 path).
    """
    N, inp = x.shape
    assert inp == params["inp"], "input feature dim mismatch with prepared params"
    assert N % 8 == 0, "batch size must be a multiple of 8 (TPU sublanes)"
    assert N >= 2, "BatchNorm1d training statistics need batch >= 2"

    inp_p, out_p = params["inp_p"], params["out_p"]
    tn, tk = params["tn"], params["tk"]
    mm_dtype = params["matmul_dtype"]
    w, gamma, beta = params["w"], params["gamma"], params["beta"]

    # Cast once in the wrapper: halves x DMA bytes vs. re-casting per tile
    # inside the kernel (and lets tiles be bigger for the same VMEM).
    x = x.astype(mm_dtype)
    if inp_p != inp:
        # TODO(synk): only hit for ragged inp; pre-pad activations upstream to
        # avoid this extra HBM round trip in the hot path.
        x = jnp.pad(x, ((0, 0), (0, inp_p - inp)))

    itemsize = jnp.dtype(mm_dtype).itemsize
    # Hold x fully resident across the K axis (DMA'd once) when it fits a
    # modest VMEM budget; otherwise stream (N, tk) tiles per K step.
    x_full_k = 2 * N * inp_p * itemsize <= (16 << 20)
    if x_full_k:
        x_spec = pl.BlockSpec((N, inp_p), lambda j, k: (0, 0))
    else:
        x_spec = pl.BlockSpec((N, tk), lambda j, k: (0, k))

    # Per-core VMEM budget (everything conservatively double-buffered) + slack,
    # capped at v7x's 64 MiB physical VMEM.
    x_bytes = 2 * N * (inp_p if x_full_k else tk) * itemsize
    w_bytes = 2 * tk * tn * itemsize
    o_bytes = 2 * N * tn * 4
    misc_bytes = 4 * tn * 4 * 2
    budget = x_bytes + w_bytes + o_bytes + misc_bytes
    vmem_limit = int(min(max(budget * 3 // 2 + (4 << 20), 16 << 20), 64 << 20))

    grid = (out_p // tn, inp_p // tk)  # (feature tiles, K tiles) -- K last

    kernel = partial(nn_layer_kernel, eps=eps, tk=tk, x_full_k=x_full_k)

    result = pl.pallas_call(
        kernel,
        out_shape=jax.ShapeDtypeStruct((N, out_p), jnp.float32),
        grid_spec=pltpu.PrefetchScalarGridSpec(
            num_scalar_prefetch=0,
            grid=grid,
            in_specs=[
                x_spec,                                       # x
                pl.BlockSpec((tk, tn), lambda j, k: (k, j)),  # w
                pl.BlockSpec((1, tn), lambda j, k: (0, j)),   # gamma
                pl.BlockSpec((1, tn), lambda j, k: (0, j)),   # beta
            ],
            out_specs=pl.BlockSpec((N, tn), lambda j, k: (0, j)),
        ),
        compiler_params=pltpu.CompilerParams(
            # Feature tiles are fully independent -> shard across the 2 TCs on
            # v7x; K is the reduction axis for the resident output/accumulator.
            dimension_semantics=("parallel", "arbitrary"),
            vmem_limit_bytes=vmem_limit,
        ),
    )(x, w, gamma, beta)

    out = params["out"]
    return result[:, :out] if out_p != out else result


def nn_layer_ref(x, w, b, gamma, beta, eps=1e-5):
    """Pure-JAX reference matching the PyTorch module (bias included, f32)."""
    y = x @ w + b
    mean = jnp.mean(y, axis=0, keepdims=True)
    var = jnp.mean((y - mean) ** 2, axis=0, keepdims=True)
    y = (y - mean) / jnp.sqrt(var + eps)
    y = y * gamma + beta
    return jnp.maximum(y, 0.0)


if __name__ == "__main__":
    key = jax.random.PRNGKey(0)
    k1, k2, k3, k4, k5, k6 = jax.random.split(key, 6)

    # --- Test 1: multi-tile grid (2 feature tiles x 2 K tiles), bf16 matmul
    #     path (default), full-K-resident x.
    N, INP, OUT = 64, 1024, 512
    x = jax.random.normal(k1, (N, INP), dtype=jnp.float32)
    bound = 1.0 / (INP ** 0.5)  # PyTorch-like Linear init bounds
    w = jax.random.uniform(k2, (INP, OUT), minval=-bound, maxval=bound,
                           dtype=jnp.float32)            # pre-transposed (inp, out)
    b = jax.random.uniform(k3, (OUT,), minval=-bound, maxval=bound,
                           dtype=jnp.float32)
    gamma = jnp.ones((OUT,), dtype=jnp.float32)           # BatchNorm1d weight init
    beta = jnp.zeros((OUT,), dtype=jnp.float32)           # BatchNorm1d bias init

    params = prepare_nn_layer_params(w, gamma, beta, b=b)  # bf16 by default
    out_k = nn_layer(x, params)
    jax.block_until_ready(out_k)
    ref = nn_layer_ref(x, w, b, gamma, beta)
    assert out_k.shape == ref.shape
    assert jnp.allclose(out_k, ref, atol=5e-2, rtol=5e-2), "mismatch (bf16 path)"

    # --- Test 2: ragged feature dims exercise the padding path; f32 matmul
    #     path for a tight-tolerance exactness check, non-trivial gamma/beta.
    N2, INP2, OUT2 = 16, 40, 72
    x2 = jax.random.normal(k4, (N2, INP2), dtype=jnp.float32)
    bound2 = 1.0 / (INP2 ** 0.5)
    w2 = jax.random.uniform(k5, (INP2, OUT2), minval=-bound2, maxval=bound2,
                            dtype=jnp.float32)
    b2 = jax.random.uniform(k6, (OUT2,), minval=-bound2, maxval=bound2,
                            dtype=jnp.float32)
    gamma2 = 0.5 + jax.random.uniform(k4, (OUT2,), dtype=jnp.float32)
    beta2 = 0.1 * jax.random.normal(k5, (OUT2,), dtype=jnp.float32)

    params2 = prepare_nn_layer_params(w2, gamma2, beta2, b=b2,
                                      matmul_dtype=jnp.float32)
    out_k2 = nn_layer(x2, params2)
    jax.block_until_ready(out_k2)
    ref2 = nn_layer_ref(x2, w2, b2, gamma2, beta2)
    assert out_k2.shape == ref2.shape
    assert jnp.allclose(out_k2, ref2, atol=2e-4, rtol=2e-4), \
        "mismatch vs reference (ragged / f32 path)"

    print("KERNEL_OK")
</pallas_src>

<mosaic_0001>
module attributes {stable_mosaic.version = 11 : i64} {
  func.func @nn_layer_kernel(%arg0: i32, %arg1: i32, %arg2: memref<64x1024xbf16, #tpu.memory_space<vmem>>, %arg3: memref<512x256xbf16, #tpu.memory_space<vmem>>, %arg4: memref<1x256xf32, #tpu.memory_space<vmem>>, %arg5: memref<1x256xf32, #tpu.memory_space<vmem>>, %arg6: memref<64x256xf32, #tpu.memory_space<vmem>>) attributes {dimension_semantics = [#tpu.dimension_semantics<parallel>, #tpu.dimension_semantics<arbitrary>], iteration_bounds = array<i64: 2, 2>, scalar_prefetch = 0 : i64, scratch_operands = 0 : i64, tpu.core_type = #tpu.core_type<tc>, window_params = [{pipeline_mode = #tpu.pipeline_mode<synchronous>, transform_indices = @transform_0, window_bounds = array<i64: 64, 1024>}, {transform_indices = @transform_1, window_bounds = array<i64: 512, 256>}, {transform_indices = @transform_2, window_bounds = array<i64: 1, 256>}, {transform_indices = @transform_3, window_bounds = array<i64: 1, 256>}, {transform_indices = @transform_4, window_bounds = array<i64: 64, 256>}]} {
    %c0_i32 = arith.constant 0 : i32
    %0 = arith.cmpi eq, %arg1, %c0_i32 : i32
    %1 = arith.extui %0 : i1 to i32
    %c0_i32_0 = arith.constant 0 : i32
    %2 = arith.cmpi ne, %1, %c0_i32_0 : i32
    scf.if %2 {
      %cst_8 = arith.constant 0.000000e+00 : f32
      %15 = vector.broadcast %cst_8 : f32 to vector<64x256xf32>
      %c0_9 = arith.constant 0 : index
      %c0_10 = arith.constant 0 : index
      %16 = vector.load %arg6[%c0_9, %c0_10] : memref<64x256xf32, #tpu.memory_space<vmem>>, vector<64x256xf32>
      tpu.vector_store %arg6[%c0_9, %c0_10], %15 {strides = array<i32>} : memref<64x256xf32, #tpu.memory_space<vmem>>, vector<64x256xf32>,
    } else {
    }
    %c512_i32 = arith.constant 512 : i32
    %3 = arith.muli %arg1, %c512_i32 : i32
    %4 = tpu.assume_multiple %3, 128 : i32
    %c0 = arith.constant 0 : index
    %5 = arith.index_cast %4 : i32 to index
    %6 = vector.load %arg2[%c0, %5] : memref<64x1024xbf16, #tpu.memory_space<vmem>>, vector<64x512xbf16>
    %c0_1 = arith.constant 0 : index
    %c0_2 = arith.constant 0 : index
    %7 = vector.load %arg6[%c0_1, %c0_2] : memref<64x256xf32, #tpu.memory_space<vmem>>, vector<64x256xf32>
    %c0_3 = arith.constant 0 : index
    %c0_4 = arith.constant 0 : index
    %8 = vector.load %arg3[%c0_3, %c0_4] : memref<512x256xbf16, #tpu.memory_space<vmem>>, vector<512x256xbf16>
    %cst = arith.constant dense<0.000000e+00> : vector<64x256xf32>
    %9 = tpu.matmul %6, %8, %cst {dimension_numbers = #tpu.dot_dimension_numbers<[1], [0], [0], [1], [0, 0, 1, 1], [], []>} : vector<64x512xbf16>, vector<512x256xbf16>, vector<64x256xf32> -> vector<64x256xf32>
    %10 = arith.addf %7, %9 : vector<64x256xf32>
    %c0_5 = arith.constant 0 : index
    %c0_6 = arith.constant 0 : index
    %11 = vector.load %arg6[%c0_5, %c0_6] : memref<64x256xf32, #tpu.memory_space<vmem>>, vector<64x256xf32>
    tpu.vector_store %arg6[%c0_5, %c0_6], %10 {strides = array<i32>} : memref<64x256xf32, #tpu.memory_space<vmem>>, vector<64x256xf32>,
    %c1_i32 = arith.constant 1 : i32
    %12 = arith.cmpi eq, %arg1, %c1_i32 : i32
    %13 = arith.extui %12 : i1 to i32
    %c0_i32_7 = arith.constant 0 : i32
    %14 = arith.cmpi ne, %13, %c0_i32_7 : i32
    scf.if %14 {
      %c0_8 = arith.constant 0 : index
      %c0_9 = arith.constant 0 : index
      %15 = vector.load %arg6[%c0_8, %c0_9] : memref<64x256xf32, #tpu.memory_space<vmem>>, vector<64x256xf32>
      %cst_10 = arith.constant dense<0.000000e+00> : vector<256xf32>
      %16 = vector.multi_reduction <add>, %15, %cst_10 [0] : vector<64x256xf32> to vector<256xf32>
      %17 = vector.shape_cast %16 : vector<256xf32> to vector<1x256xf32>
      %cst_11 = arith.constant 6.400000e+01 : f32
      %18 = vector.broadcast %cst_11 : f32 to vector<1x256xf32>
      %19 = arith.divf %17, %18 : vector<1x256xf32>
      %20 = vector.broadcast %19 : vector<1x256xf32> to vector<64x256xf32>
      %21 = arith.subf %15, %20 : vector<64x256xf32>
      %22 = arith.mulf %21, %21 : vector<64x256xf32>
      %cst_12 = arith.constant dense<0.000000e+00> : vector<256xf32>
      %23 = vector.multi_reduction <add>, %22, %cst_12 [0] : vector<64x256xf32> to vector<256xf32>
      %24 = vector.shape_cast %23 : vector<256xf32> to vector<1x256xf32>
      %cst_13 = arith.constant 6.400000e+01 : f32
      %25 = vector.broadcast %cst_13 : f32 to vector<1x256xf32>
      %26 = arith.divf %24, %25 : vector<1x256xf32>
      %c0_14 = arith.constant 0 : index
      %c0_15 = arith.constant 0 : index
      %27 = vector.load %arg4[%c0_14, %c0_15] : memref<1x256xf32, #tpu.memory_space<vmem>>, vector<1x256xf32>
      %cst_16 = arith.constant 9.99999974E-6 : f32
      %28 = vector.broadcast %cst_16 : f32 to vector<1x256xf32>
      %29 = arith.addf %26, %28 : vector<1x256xf32>
      %30 = math.rsqrt %29 : vector<1x256xf32>
      %31 = arith.mulf %27, %30 : vector<1x256xf32>
      %32 = vector.broadcast %31 : vector<1x256xf32> to vector<64x256xf32>
      %33 = arith.mulf %21, %32 : vector<64x256xf32>
      %c0_17 = arith.constant 0 : index
      %c0_18 = arith.constant 0 : index
      %34 = vector.load %arg5[%c0_17, %c0_18] : memref<1x256xf32, #tpu.memory_space<vmem>>, vector<1x256xf32>
      %35 = vector.broadcast %34 : vector<1x256xf32> to vector<64x256xf32>
      %36 = arith.addf %33, %35 : vector<64x256xf32>
      %cst_19 = arith.constant 0.000000e+00 : f32
      %37 = vector.broadcast %cst_19 : f32 to vector<64x256xf32>
      %38 = arith.maximumf %36, %37 : vector<64x256xf32>
      %c0_20 = arith.constant 0 : index
      %c0_21 = arith.constant 0 : index
      %39 = vector.load %arg6[%c0_20, %c0_21] : memref<64x256xf32, #tpu.memory_space<vmem>>, vector<64x256xf32>
      tpu.vector_store %arg6[%c0_20, %c0_21], %38 {strides = array<i32>} : memref<64x256xf32, #tpu.memory_space<vmem>>, vector<64x256xf32>,
    } else {
    }
    return
  }
  func.func @transform_0(%arg0: i32, %arg1: i32) -> (i32, i32) {
    %c0_i32 = arith.constant 0 : i32
    %c0_i32_0 = arith.constant 0 : i32
    %c0_i32_1 = arith.constant 0 : i32
    return %c0_i32, %c0_i32_0 : i32, i32
  }
  func.func @transform_1(%arg0: i32, %arg1: i32) -> (i32, i32) {
    %c0_i32 = arith.constant 0 : i32
    return %arg1, %arg0 : i32, i32
  }
  func.func @transform_2(%arg0: i32, %arg1: i32) -> (i32, i32) {
    %c0_i32 = arith.constant 0 : i32
    %c0_i32_0 = arith.constant 0 : i32
    return %c0_i32, %arg0 : i32, i32
  }
  func.func @transform_3(%arg0: i32, %arg1: i32) -> (i32, i32) {
    %c0_i32 = arith.constant 0 : i32
    %c0_i32_0 = arith.constant 0 : i32
    return %c0_i32, %arg0 : i32, i32
  }
  func.func @transform_4(%arg0: i32, %arg1: i32) -> (i32, i32) {
    %c0_i32 = arith.constant 0 : i32
    %c0_i32_0 = arith.constant 0 : i32
    return %c0_i32, %arg0 : i32, i32
  }
}

</mosaic_0001>

<bundles_post_ra>
// kernel: tpu_custom_call.1
= control target key start
LH: loop header
LB: loop body
LE: loop exit
PB: predicated region body
PF: predicated region fallthrough
CT: control target
= control target key end

     0   :  { %s2494_s0 = inlined_call_operand.hbm [shape: bf16[64,1024], index: 0, kind: input, shape index: {}]   ;;  %s2495_s1 = inlined_call_operand.hbm [shape: bf16[1024,512], index: 1, kind: input, shape index: {}]   ;;  %s2496_s2 = inlined_call_operand.hbm [shape: f32[1,512], index: 2, kind: input, shape index: {}]   ;;  %s2497_s3 = inlined_call_operand.vmem [shape: f32[1,512], index: 3, kind: input, shape index: {}]   ;;  %s2498_s4 = inlined_call_operand.hbm [shape: f32[64,512], index: 4, kind: output, shape index: {}]  }
   0x1   :  { %2507 = sst [smem:[#allocation16_spill]] %s2494_s0 }
   0x2   :  { %2508 = sst [smem:[#allocation17_spill]] %s2495_s1 }
   0x3   :  { %2509 = sst [smem:[#allocation18_spill]] %s2497_s3 }
   0x4   :  { %2510 = sst [smem:[#allocation19_spill]] %s2498_s4 }
   0x5   :  { %9 = vsyncpa [#allocation3], 0 }
   0x6   :  { %10 = vsyncpa [#allocation6], 0 }
   0x7   :  { %12 = vsyncpa [#allocation6 + $0x1], 0 }
   0x8   :  { %13 = vsyncpa [#allocation4], 0 }
   0x9   :  { %15 = vsyncpa [#allocation4 + $0x1], 0  ;;  %s1959_s15 = smov 0   ;;  %s1961_s16 = smov 0  }
   0xa   :  { %s1963_s17 = smov 0   ;;  %s1965_s18 = smov 0  }
   0xb   :  { %s1967_s19 = smov 0   ;;  %s1969_s20 = smov 0  }
   0xc   :  { %s1971_s21 = smov 0   ;;  %s1973_s22 = smov 0  }
   0xd   :  { %s1975_s23 = smov 0   ;;  %s1977_s24 = smov 0  }
   0xe   :  { %s1979_s25 = smov 0  }
   0xf LB: > { %2511 = sst [smem:[#allocation13_spill]] %s1902_s21  ;;  %s30_s26 = sadd.s32 1, %s1910_s23  ;;  %s1918_s25 = sphi %s1979_s25, %s21_s25   ;;  %s1914_s24 = sphi %s1977_s24, %s2548_s24   ;;  %s1910_s23 = sphi %s1975_s23, %s2547_s23   ;;  %s1906_s22 = sphi %s1973_s22, %s2546_s22   ;;  %s1902_s21 = sphi %s1971_s21, %s2545_s21   ;;  %s1898_s20 = sphi %s1969_s20, %s2544_s20   ;;  %s1894_s19 = sphi %s1967_s19, %s2543_s19   ;;  %s1890_s18 = sphi %s1965_s18, %s2542_s18   ;;  %s1886_s17 = sphi %s1963_s17, %s2541_s17   ;;  %s1882_s16 = sphi %s1961_s16, %s2540_s16   ;;  %s1878_s15 = sphi %s1959_s15, %s2539_s15  }
  0x10   : > { %s33_s27 = sadd.s32 1, %s1914_s24  ;;  %p31_p0 = scmp.ge.s32.totalorder %s30_s26, 2 }
  0x11   : > { %s63_s28 = sadd.s32 1, %s1898_s20  ;;  %p70_p1 = scmp.ne.s32.totalorder %s1898_s20, %s1894_s19 }
  0x12   : > { %p2504_p2 = scmp.eq.s32.totalorder %s1918_s25, 0  ;;  %s2550_s26 = smov (%p31_p0, %s30_s26), 0 }
  0x13   : > { %2512 = sst [smem:[#allocation14_spill]] %s2550_s26  ;;  %s2552_s27 = smov (!%p31_p0, %s33_s27), %s1914_s24 }
  0x14   : > { %s58_s29 = ssub.s32 %s1910_s23, %s2550_s26  ;;  %p2027_p3 = por %p2504_p2, %p70_p1 }
  0x15   : > { %p35_p4 = scmp.ge.s32.totalorder %s2552_s27, 2  ;;  %p2503_p5 = scmp.lt.s32.totalorder %s1918_s25, 4 }
  0x16   : > { %s191_s5 = sand.u32 1, %s1918_s25   ;;  %s193_s6 = sand.u32 1, %s1898_s20  }
  0x17   : > { %s2554_s27 = smov (%p35_p4, %s2552_s27), 0  ;;  %s1374_s8 = sshll.u32 %s193_s6, 9 }
  0x18   : > { %2514 = sst [smem:[#allocation15_spill]] %s2554_s27  ;;  %s2038_s7 = ssub.s32 %s1914_s24, %s2554_s27 }
  0x19   : > { %s60_s9 = sor.u32 %s2038_s7, %s58_s29  ;;  %s1376_s10 = sshll.u32 %s1914_s24, 1 }
  0x1a   : > { %p61_p6 = scmp.eq.s32.totalorder %s60_s9, 0  ;;  %s1477_s11 = sshll.u32 %s1910_s23, 8 }
  0x1b   : > { %s195_s12 = scalar_lea.vmem [#allocation5], %s1374_s8  ;;  %s202_s26 = sadd.s32 %s1477_s11, %s1376_s10 }
  0x1c   : > { %s205_s13 = sshll.u32 %s195_s12, 4  ;;  %s1378_s4 = sshll.u32 %s202_s26, 6  ;;  %s206_s13 = int_to_ptr.vmem [resolvable:$true] %s205_s13 }
  0x1d   : > { %s2044_s14 = scalar_select %p61_p6, %s1898_s20, %s63_s28  }
  0x1e   : > { %p2050_p7 = pnand %p2503_p5, %p2027_p3  ;;  %s2516_s1 = sld [smem:[#allocation17_spill]] }
  0x1f   : > { %s2057_s6 = scalar_lea.sflag [#allocation6], %s191_s5  ;;  %s1721_s28 = scalar_lea.vmem %s206_s13, 8192 }
  0x20   : > { %p1710_p8 = pneg %p2050_p7  ;;  %p1722_p9 = scmp.ne.s32.totalorder %s206_s13, %s1721_s28 }
  0x21   : > { %s1920_s26 = smov [#allocation5]  }
  0x22   : > { %p1724_p10 = pnand %p1722_p9, %p1710_p8  ;;  %s1726_s30 = sshll.u32 %s1920_s26, 4  ;;  %s1727_s30 = int_to_ptr.vmem [resolvable:$false] %s1726_s30 }
  0x23   : > { %s1728_s8 = scalar_lea.vmem %s1727_s30, 16384  ;;  %p1729_p12 = scmp.lt.s32.totalorder %s206_s13, %s1727_s30 }
  0x24   : > { %s204_s29 = scalar_lea.hbm %s2516_s1, %s1378_s4  ;;  %p1725_p11 = pneg %p1724_p10 }
  0x25   : > { %p1730_p13 = scmp.lt.s32.totalorder %s1728_s8, %s1721_s28 }
  0x27   : > { %p1731_p0 = por %p1730_p13, %p1729_p12 }
  0x29   : > { %p1732_p1 = pnand %p1731_p0, %p1725_p11 }
  0x2b   : > { %1735 = shalt.err (!%p1732_p1)
}
  0x2c   : > { %s1921_s3 = smov 256   ;;  %s1922_s4 = smov 128  }
  0x2d   : > { %s1923_s27 = smov 8   ;;  %s2065_s5 = sadd.s32 4294967295, %s1918_s25  }
  0x2e   : > { %1497 = dma.hbm_to_vmem [thread:$0]  (!%p2050_p7), %s204_s29, 8192, %s206_s13, %s2057_s6, %s1921_s3, %s1922_s4, %s1923_s27  }
  0x2f   : > { %p76_p3 = scmp.ne.s32.totalorder %s1894_s19, %s1890_s18  ;;  %p2505_p4 = scmp.eq.s32.totalorder %s2065_s5, 0 }
  0x30   : > { %p1371_p8 = scmp.ge.s32.totalorder %s1918_s25, 1  ;;  %p165_p10 = scmp.lt.s32.totalorder %s1918_s25, 5 }
  0x31   : > { %p2074_p9 = por %p2505_p4, %p76_p3  ;;  %s1924_s21 = smov [#allocation2]  }
  0x32   : > { %p2079_p11 = pnand %p1371_p8, %p165_p10  ;;  %s177_s11 = sshll.u32 %s1924_s21, 4  ;;  %s178_s11 = int_to_ptr.vmem [resolvable:$true] %s177_s11 }
  0x33   : > { %s1747_s18 = scalar_lea.vmem %s178_s11, 4096  ;;  %p1755_p5 = scmp.lt.s32.totalorder %s178_s11, %s178_s11 }
  0x34   : > { %p1490_p7 = pneg %p2079_p11  ;;  %p1748_p0 = scmp.ne.s32.totalorder %s178_s11, %s1747_s18 }
  0x35   : > { %p1756_p6 = scmp.lt.s32.totalorder %s1747_s18, %s1747_s18 }
  0x36   : > { %p1491_p12 = pnand %p1490_p7, %p2505_p4 }
  0x37   : > { %p1757_p2 = por %p1756_p6, %p1755_p5 }
  0x38   : > { %p1738_p13 = pneg %p1491_p12 }
  0x3a   : > { %p1750_p1 = pnand %p1748_p0, %p1738_p13 }
  0x3c   : > { %p1751_p3 = pneg %p1750_p1 }
  0x3e   : > { %p1758_p8 = pnand %p1757_p2, %p1751_p3 }
  0x40   : > { %1761 = shalt.err (!%p1758_p8)
}
  0x41   : > { %s1925_s12 = smov 512   ;;  %s1926_s13 = smov 32  }
  0x42   : > { %s2519_s0 = sld [smem:[#allocation16_spill]]  ;;  %s1370_s26 = sadd.s32 4294967294, %s1918_s25  }
  0x43   : > { %p87_p2 = scmp.eq.s32.totalorder %s2038_s7, 0  ;;  %s89_s30 = sadd.s32 1, %s1886_s17 }
  0x44   : > { %p96_p5 = scmp.ne.s32.totalorder %s1886_s17, %s1882_s16  ;;  %p2520_p6 = scmp.eq.s32.totalorder %s1918_s25, 0 }
  0x45   : > { %s2096_s8 = scalar_select %p87_p2, %s1886_s17, %s89_s30  }
  0x46   : > { %p2100_p10 = por %p96_p5, %p2520_p6  ;;  %p102_p7 = scmp.ne.s32.totalorder %s1882_s16, %s1878_s15 }
  0x47   : > { %p2522_p13 = scmp.eq.s32.totalorder %s2065_s5, 3  ;;  %s217_s27 = sand.u32 1, %s1886_s17  }
  0x48   : > { %1493 = dma.hbm_to_vmem [thread:$0]  (!%p1491_p12), %s2519_s0, 4096, %s178_s11, [#allocation3], %s1925_s12, %s1925_s12, %s1926_s13  }
  0x49   : > { %p2108_p0 = por %p2522_p13, %p96_p5  ;;  %p158_p12 = scmp.eq.s32.totalorder %s1370_s26, 3 }
  0x4a   : > { %p2114_p1 = por %p102_p7, %p2505_p4  ;;  %s1379_s11 = sshll.u32 %s217_s27, 1 }
  0x4b   : > { %s2523_s4 = scalar_select %p2108_p0, 1, 0 }
  0x4c   : > { %p2119_p3 = por %p158_p12, %p102_p7  ;;  %s1478_s18 = sshll.u32 %s1914_s24, 5 }
  0x4d   : > { %s225_s29 = scalar_lea.hbm %s2496_s2, %s1478_s18  ;;  %s219_s28 = scalar_lea.vmem [#allocation7], %s1379_s11 }
  0x4e   : > { %s2525_s21 = scalar_select %p2119_p3, 1, 0 }
  0x4f   : > { %s227_s30 = sshll.u32 %s219_s28, 4  ;;  %p2526_p8 = scmp.lt.s32.totalorder %s1918_s25, 4  ;;  %s228_s30 = int_to_ptr.vmem [resolvable:$true] %s227_s30 }
  0x50   : > { %s1775_s0 = scalar_lea.vmem %s228_s30, 32  ;;  %s1927_s27 = smov [#allocation7]  }
  0x51   : > { %p2131_p2 = pnand %p2526_p8, %p2100_p10  ;;  %p1776_p6 = scmp.ne.s32.totalorder %s228_s30, %s1775_s0 }
  0x52   : > { %s1780_s1 = sshll.u32 %s1927_s27, 4  ;;  %s1781_s1 = int_to_ptr.vmem [resolvable:$false] %s1780_s1 }
  0x53   : > { %p1764_p5 = pneg %p2131_p2  ;;  %s1782_s18 = scalar_lea.vmem %s1781_s1, 64 }
  0x54   : > { %p1783_p12 = scmp.lt.s32.totalorder %s228_s30, %s1781_s1  ;;  %p1784_p4 = scmp.lt.s32.totalorder %s1782_s18, %s1775_s0 }
  0x55   : > { %p1778_p7 = pnand %p1776_p6, %p1764_p5 }
  0x56   : > { %p1785_p3 = por %p1784_p4, %p1783_p12 }
  0x57   : > { %p1779_p13 = pneg %p1778_p7 }
  0x59   : > { %p1786_p0 = pnand %p1785_p3, %p1779_p13 }
  0x5b   : > { %1789 = shalt.err (!%p1786_p0)
}
  0x5c   : > { %1500 = dma.hbm_to_vmem [thread:$0]  (!%p2131_p2), %s225_s29, 32, %s228_s30, %s2057_s6  }
  0x5d   : > { %244 = sbr.rel (%p2079_p11) target bundleno = 558 (0x22e), region = 36  ;;  %p2528_p10 = scmp.eq.s32.totalorder (!%p2079_p11), %s2065_s5, 0 }
  0x62   : > { %1861 = dma.done.wait (%p2528_p10), [#allocation3], 4096   ;;  %p2529_p8 = pmov %p2528_p10 }
  0x63   : > { %s250_s0 = sand.u32 1, %s2065_s5   ;;  %s252_s1 = sand.u32 1, %s1894_s19  }
  0x64   : > { %1863 = vsyncadd (%p2529_p8), [#allocation3], 4294963200  ;;  %s1384_s3 = sshll.u32 %s252_s1, 9  ;;  %s251_s11 = scalar_lea.sflag [#allocation6], %s250_s0 }
  0x65   : > { %s2148_s12 = scalar_lea.vmem [#allocation5], %s1384_s3 }
  0x66   : > { %1865 = dma.done.wait (%p2074_p9), %s251_s11, 8192  }
  0x67   : > { %1867 = vsyncadd (%p2074_p9), %s251_s11, 4294959104  ;;  %s2155_s6 = sand.u32 1, %s1882_s16  }
  0x68   : > { %s1385_s10 = sshll.u32 %s2155_s6, 1 }
  0x69   : > { %s2158_s13 = scalar_lea.vmem [#allocation7], %s1385_s10 }
  0x6a   : > { %1869 = dma.done.wait (%p2114_p1), %s251_s11, 32  }
  0x6b   : > { %1871 = vsyncadd (%p2114_p1), %s251_s11, 4294967264  ;;  %s1386_s5 = sshll.u32 %s2155_s6, 7  ;;  %s1387_s29 = sshll.u32 %s1906_s22, 1 }
  0x6c   : > { %p301_p4 = scmp.lt.s32.totalorder %s1387_s29, 3  ;;  %s2530_s30 = sld [smem:[#allocation18_spill]] }
  0x6d   : > { %s2172_s27 = scalar_lea.vmem [#allocation8], %s1386_s5  ;;  %s2531_s18 = sld [smem:[#allocation13_spill]] }
  0x6e   : > { %s2556_s29 = smov (!%p301_p4, %s1387_s29), 3 }
  0x72   : > { %s303_s26 = scalar_lea.vmem %s2530_s30, %s2556_s29 }
  0x73   : > { %p1388_p9 = scmp.ne.s32.totalorder %s2531_s18, 0 }
  0x75   : > { %309 = sbr.rel (%p1388_p9) target bundleno = 131 (0x83), region = 52 }
  0x7a   : > { %v1928_v0 = vmov 0.0  }
  0x7b   : > { %310 = vst [vmem:[%s2172_s27] sm:$0xff] %v1928_v0  ;;  %311 = vst [vmem:[%s2172_s27 + $0x8] sm:$0xff] %v1928_v0 }
  0x7c   : > { %312 = vst [vmem:[%s2172_s27 + $0x10] sm:$0xff] %v1928_v0  ;;  %313 = vst [vmem:[%s2172_s27 + $0x18] sm:$0xff] %v1928_v0 }
  0x7d   : > { %314 = vst [vmem:[%s2172_s27 + $0x20] sm:$0xff] %v1928_v0  ;;  %315 = vst [vmem:[%s2172_s27 + $0x28] sm:$0xff] %v1928_v0 }
  0x7e   : > { %316 = vst [vmem:[%s2172_s27 + $0x30] sm:$0xff] %v1928_v0  ;;  %317 = vst [vmem:[%s2172_s27 + $0x38] sm:$0xff] %v1928_v0 }
  0x7f   : > { %318 = vst [vmem:[%s2172_s27 + $0x40] sm:$0xff] %v1928_v0  ;;  %319 = vst [vmem:[%s2172_s27 + $0x48] sm:$0xff] %v1928_v0 }
  0x80   : > { %320 = vst [vmem:[%s2172_s27 + $0x50] sm:$0xff] %v1928_v0  ;;  %321 = vst [vmem:[%s2172_s27 + $0x58] sm:$0xff] %v1928_v0 }
  0x81   : > { %322 = vst [vmem:[%s2172_s27 + $0x60] sm:$0xff] %v1928_v0  ;;  %323 = vst [vmem:[%s2172_s27 + $0x68] sm:$0xff] %v1928_v0 }
  0x82   : > { %324 = vst [vmem:[%s2172_s27 + $0x70] sm:$0xff] %v1928_v0  ;;  %325 = vst [vmem:[%s2172_s27 + $0x78] sm:$0xff] %v1928_v0 }
  0x83 PF: > { %v1608_v1 = vld [vmem:[%s2148_s12 + $0x74] ss:$8 sps:$4 sm:$0xff]   ;;  %v1612_v3 = vld [vmem:[%s2148_s12 + $0x70] ss:$8 sps:$4 sm:$0xff]   ;;  %v1614_v5 = vld [vmem:[%s2148_s12 + $0x64] ss:$8 sps:$4 sm:$0xff]  }
  0x84   : > { %v1610_v2 = vld [vmem:[%s2148_s12 + $0x174] ss:$8 sps:$4 sm:$0xff]   ;;  %827 = vmatprep.subr.bf16.mxu0 %v1608_v1  ;;  %v1613_v4 = vld [vmem:[%s2148_s12 + $0x170] ss:$8 sps:$4 sm:$0xff]   ;;  %v1616_v6 = vld [vmem:[%s2148_s12 + $0x164] ss:$8 sps:$4 sm:$0xff]  }
  0x85   : > { %900 = vmatprep.subr.bf16.mxu1 %v1610_v2  ;;  %828 = vmatpush1.bf16.msra.mxu0 %v1612_v3  ;;  %v1618_v7 = vld [vmem:[%s2148_s12 + $0x60] ss:$8 sps:$4 sm:$0xff]   ;;  %v1620_v9 = vld [vmem:[%s2148_s12 + $0x54] ss:$8 sps:$4 sm:$0xff]   ;;  %v1624_v11 = vld [vmem:[%s2148_s12 + $0x50] ss:$8 sps:$4 sm:$0xff]  }
  0x86   : > { %901 = vmatpush1.bf16.msra.mxu1 %v1613_v4  ;;  %829 = vmatprep.subr.bf16.mxu0 %v1614_v5  ;;  %v1619_v8 = vld [vmem:[%s2148_s12 + $0x160] ss:$8 sps:$4 sm:$0xff]   ;;  %v1622_v10 = vld [vmem:[%s2148_s12 + $0x154] ss:$8 sps:$4 sm:$0xff]   ;;  %v1625_v12 = vld [vmem:[%s2148_s12 + $0x150] ss:$8 sps:$4 sm:$0xff]  }
  0x87   : > { %902 = vmatprep.subr.bf16.mxu1 %v1616_v6  ;;  %v1626_v13 = vld [vmem:[%s2148_s12 + $0x44] ss:$8 sps:$4 sm:$0xff]   ;;  %v1630_v15 = vld [vmem:[%s2148_s12 + $0x40] ss:$8 sps:$4 sm:$0xff]   ;;  %v1632_v17 = vld [vmem:[%s2148_s12 + $0x34] ss:$8 sps:$4 sm:$0xff]  }
  0x88   : > { %v1628_v14 = vld [vmem:[%s2148_s12 + $0x144] ss:$8 sps:$4 sm:$0xff]   ;;  %v1631_v16 = vld [vmem:[%s2148_s12 + $0x140] ss:$8 sps:$4 sm:$0xff]   ;;  %v1634_v18 = vld [vmem:[%s2148_s12 + $0x134] ss:$8 sps:$4 sm:$0xff]  }
  0x89   : > { %830 = vmatpush1.bf16.msra.mxu0 %v1618_v7  ;;  %v1636_v19 = vld [vmem:[%s2148_s12 + $0x30] ss:$8 sps:$4 sm:$0xff]   ;;  %v1638_v21 = vld [vmem:[%s2148_s12 + $0x24] ss:$8 sps:$4 sm:$0xff]   ;;  %v1642_v23 = vld [vmem:[%s2148_s12 + $0x20] ss:$8 sps:$4 sm:$0xff]  }
  0x8a   : > { %903 = vmatpush1.bf16.msra.mxu1 %v1619_v8  ;;  %831 = vmatprep.subr.bf16.mxu0 %v1620_v9  ;;  %v1637_v20 = vld [vmem:[%s2148_s12 + $0x130] ss:$8 sps:$4 sm:$0xff]   ;;  %v1640_v22 = vld [vmem:[%s2148_s12 + $0x124] ss:$8 sps:$4 sm:$0xff]   ;;  %v1643_v24 = vld [vmem:[%s2148_s12 + $0x120] ss:$8 sps:$4 sm:$0xff]  }
  0x8b   : > { %904 = vmatprep.subr.bf16.mxu1 %v1622_v10  ;;  %v1644_v25 = vld [vmem:[%s2148_s12 + $0x14] ss:$8 sps:$4 sm:$0xff]   ;;  %v1648_v27 = vld [vmem:[%s2148_s12 + $0x10] ss:$8 sps:$4 sm:$0xff]   ;;  %s2532_s7 = sld [smem:[#allocation13_spill]] }
  0x8c   : > { %v1646_v26 = vld [vmem:[%s2148_s12 + $0x114] ss:$8 sps:$4 sm:$0xff]   ;;  %v1649_v28 = vld [vmem:[%s2148_s12 + $0x110] ss:$8 sps:$4 sm:$0xff]   ;;  %v1650_v29 = vld [vmem:[%s2148_s12 + $0x4] ss:$8 sps:$4 sm:$0xff]  }
  0x8d   : > { %832 = vmatpush1.bf16.msra.mxu0 %v1624_v11  ;;  %v1652_v30 = vld [vmem:[%s2148_s12 + $0x104] ss:$8 sps:$4 sm:$0xff]   ;;  %v1654_v31 = vld [vmem:[%s2148_s12] ss:$8 sps:$4 sm:$0xff]   ;;  %v1656_v33 = vld [vmem:[%s2148_s12 + $0xf4] ss:$8 sps:$4 sm:$0xff]  }
  0x8e   : > { %905 = vmatpush1.bf16.msra.mxu1 %v1625_v12  ;;  %833 = vmatprep.subr.bf16.mxu0 %v1626_v13  ;;  %v1655_v32 = vld [vmem:[%s2148_s12 + $0x100] ss:$8 sps:$4 sm:$0xff]   ;;  %v1658_v34 = vld [vmem:[%s2148_s12 + $0x1f4] ss:$8 sps:$4 sm:$0xff]   ;;  %v1660_v35 = vld [vmem:[%s2148_s12 + $0xf0] ss:$8 sps:$4 sm:$0xff]  }
  0x8f   : > { %906 = vmatprep.subr.bf16.mxu1 %v1628_v14  ;;  %v1661_v36 = vld [vmem:[%s2148_s12 + $0x1f0] ss:$8 sps:$4 sm:$0xff]   ;;  %v1662_v37 = vld [vmem:[%s2148_s12 + $0xe4] ss:$8 sps:$4 sm:$0xff]   ;;  %v1666_v39 = vld [vmem:[%s2148_s12 + $0xe0] ss:$8 sps:$4 sm:$0xff]  }
  0x90   : > { %v1664_v38 = vld [vmem:[%s2148_s12 + $0x1e4] ss:$8 sps:$4 sm:$0xff]   ;;  %v1667_v40 = vld [vmem:[%s2148_s12 + $0x1e0] ss:$8 sps:$4 sm:$0xff]   ;;  %v1668_v41 = vld [vmem:[%s2148_s12 + $0xd4] ss:$8 sps:$4 sm:$0xff]  }
  0x91   : > { %834 = vmatpush1.bf16.msra.mxu0 %v1630_v15  ;;  %s1389_s0 = sshll.u32 %s2532_s7, 9  ;;  %v1670_v42 = vld [vmem:[%s2148_s12 + $0x1d4] ss:$8 sps:$4 sm:$0xff]   ;;  %v1672_v43 = vld [vmem:[%s2148_s12 + $0xd0] ss:$8 sps:$4 sm:$0xff]   ;;  %p1471_p11 = scmp.ne.s32.totalorder %s2532_s7, 1 }
  0x92   : > { %907 = vmatpush1.bf16.msra.mxu1 %v1631_v16  ;;  %835 = vmatprep.subr.bf16.mxu0 %v1632_v17  ;;  %s327_s1 = sshra.s32 %s1389_s0, 7  ;;  %v1673_v44 = vld [vmem:[%s2148_s12 + $0x1d0] ss:$8 sps:$4 sm:$0xff]   ;;  %v1674_v45 = vld [vmem:[%s2148_s12 + $0xc4] ss:$8 sps:$4 sm:$0xff]  }
  0x93   : > { %908 = vmatprep.subr.bf16.mxu1 %v1634_v18  ;;  %s1390_s3 = sshll.u32 %s327_s1, 2  ;;  %v1676_v46 = vld [vmem:[%s2148_s12 + $0x1c4] ss:$8 sps:$4 sm:$0xff]   ;;  %v1678_v51 = vld [vmem:[%s2148_s12 + $0xc0] ss:$8 sps:$4 sm:$0xff]  }
  0x94   : > { %s2238_s11 = scalar_lea.vmem [#allocation2], %s1390_s3  ;;  %v1679_v52 = vld [vmem:[%s2148_s12 + $0x1c0] ss:$8 sps:$4 sm:$0xff]   ;;  %v1680_v54 = vld [vmem:[%s2148_s12 + $0xb4] ss:$8 sps:$4 sm:$0xff]  }
  0x95   : > { %836 = vmatpush1.bf16.msra.mxu0 %v1636_v19  ;;  %v331_v47 = vld [vmem:[%s2238_s11] sm:$0xff]  ;;  %v332_v49 = vld [vmem:[%s2238_s11 + $0x8] sm:$0xff]  ;;  %v1682_v55 = vld [vmem:[%s2148_s12 + $0x1b4] ss:$8 sps:$4 sm:$0xff]  }
  0x96   : > { %909 = vmatpush1.bf16.msra.mxu1 %v1637_v20  ;;  %837 = vmatprep.subr.bf16.mxu0 %v1638_v21  ;;  %v333_v48 = vld [vmem:[%s2238_s11 + $0x20] sm:$0xff]  ;;  %v334_v50 = vld [vmem:[%s2238_s11 + $0x28] sm:$0xff]  ;;  %v1684_v57 = vld [vmem:[%s2148_s12 + $0xb0] ss:$8 sps:$4 sm:$0xff]  }
  0x97   : > { %910 = vmatprep.subr.bf16.mxu1 %v1640_v22  ;;  %v1392_v53 = vcombine.high %v331_v47, %v333_v48  ;;  %v1394_v56 = vcombine.high %v332_v49, %v334_v50  ;;  %v1685_v58 = vld [vmem:[%s2148_s12 + $0x1b0] ss:$8 sps:$4 sm:$0xff]   ;;  %v1686_v59 = vld [vmem:[%s2148_s12 + $0xa4] ss:$8 sps:$4 sm:$0xff]   ;;  %v1690_v61 = vld [vmem:[%s2148_s12 + $0xa0] ss:$8 sps:$4 sm:$0xff]   ;;  %v1391_v11 = vcombine.low %v331_v47, %v333_v48  ;;  %v1393_v12 = vcombine.low %v332_v49, %v334_v50 }
  0x98   : > { %v1688_v60 = vld [vmem:[%s2148_s12 + $0x1a4] ss:$8 sps:$4 sm:$0xff]   ;;  %v1691_v62 = vld [vmem:[%s2148_s12 + $0x1a0] ss:$8 sps:$4 sm:$0xff]   ;;  %v1692_v63 = vld [vmem:[%s2148_s12 + $0x94] ss:$8 sps:$4 sm:$0xff]  }
  0x99   : > { %838 = vmatpush1.bf16.msra.mxu0 %v1642_v23  ;;  %859 = vmatprep.mubr.bf16.mxu0 %v1392_v53  ;;  %v1694_v0 = vld [vmem:[%s2148_s12 + $0x194] ss:$8 sps:$4 sm:$0xff]   ;;  %v1696_v1 = vld [vmem:[%s2148_s12 + $0x90] ss:$8 sps:$4 sm:$0xff]   ;;  %v1698_v3 = vld [vmem:[%s2148_s12 + $0x84] ss:$8 sps:$4 sm:$0xff]  }
  0x9a   : > { %911 = vmatpush1.bf16.msra.mxu1 %v1643_v24  ;;  %839 = vmatprep.subr.bf16.mxu0 %v1644_v25  ;;  %v1697_v2 = vld [vmem:[%s2148_s12 + $0x190] ss:$8 sps:$4 sm:$0xff]   ;;  %v1700_v4 = vld [vmem:[%s2148_s12 + $0x184] ss:$8 sps:$4 sm:$0xff]   ;;  %v1702_v5 = vld [vmem:[%s2148_s12 + $0x80] ss:$8 sps:$4 sm:$0xff]  }
  0x9b   : > { %912 = vmatprep.subr.bf16.mxu1 %v1646_v26  ;;  %932 = vmatprep.mubr.bf16.mxu1 %v1394_v56  ;;  %v1703_v6 = vld [vmem:[%s2148_s12 + $0x180] ss:$8 sps:$4 sm:$0xff]  }
  0x9c   : > { %v335_v7 = vld [vmem:[%s2238_s11 + $0x40] sm:$0xff]  ;;  %v336_v9 = vld [vmem:[%s2238_s11 + $0x48] sm:$0xff] }
  0x9d   : > { %840 = vmatpush1.bf16.msra.mxu0 %v1648_v27  ;;  %v337_v8 = vld [vmem:[%s2238_s11 + $0x60] sm:$0xff]  ;;  %v338_v10 = vld [vmem:[%s2238_s11 + $0x68] sm:$0xff] }
  0x9e   : > { %913 = vmatpush1.bf16.msra.mxu1 %v1649_v28  ;;  %841 = vmatprep.subr.bf16.mxu0 %v1650_v29  ;;  %v1396_v13 = vcombine.high %v335_v7, %v337_v8  ;;  %v1398_v14 = vcombine.high %v336_v9, %v338_v10  ;;  %v339_v15 = vld [vmem:[%s2238_s11 + $0x80] sm:$0xff]  ;;  %v340_v17 = vld [vmem:[%s2238_s11 + $0x88] sm:$0xff]  ;;  %v1395_v19 = vcombine.low %v335_v7, %v337_v8 }
  0x9f   : > { %914 = vmatprep.subr.bf16.mxu1 %v1652_v30  ;;  %v341_v16 = vld [vmem:[%s2238_s11 + $0xa0] sm:$0xff]  ;;  %v342_v18 = vld [vmem:[%s2238_s11 + $0xa8] sm:$0xff]  ;;  %v1397_v20 = vcombine.low %v336_v9, %v338_v10 }
  0xa0   : > { %v1400_v21 = vcombine.high %v339_v15, %v341_v16  ;;  %v1402_v22 = vcombine.high %v340_v17, %v342_v18  ;;  %v343_v23 = vld [vmem:[%s2238_s11 + $0xc0] sm:$0xff]  ;;  %v344_v25 = vld [vmem:[%s2238_s11 + $0xc8] sm:$0xff]  ;;  %v1399_v27 = vcombine.low %v339_v15, %v341_v16  ;;  %v1401_v28 = vcombine.low %v340_v17, %v342_v18 }
  0xa1   : > { %842 = vmatpush1.bf16.msra.mxu0 %v1654_v31  ;;  %v345_v24 = vld [vmem:[%s2238_s11 + $0xe0] sm:$0xff]  ;;  %v346_v26 = vld [vmem:[%s2238_s11 + $0xe8] sm:$0xff] }
  0xa2   : > { %915 = vmatpush1.bf16.msra.mxu1 %v1655_v32  ;;  %843 = vmatprep.subr.bf16.mxu0 %v1656_v33  ;;  %v1404_v29 = vcombine.high %v343_v23, %v345_v24  ;;  %v1406_v30 = vcombine.high %v344_v25, %v346_v26  ;;  %v1403_v31 = vcombine.low %v343_v23, %v345_v24  ;;  %v350_v48 = vld [vmem:[%s2172_s27 + $0x18] sm:$0xff]  ;;  %v351_v53 = vld [vmem:[%s2172_s27 + $0x20] sm:$0xff] }
  0xa3   : > { %916 = vmatprep.subr.bf16.mxu1 %v1658_v34  ;;  %v1405_v32 = vcombine.low %v344_v25, %v346_v26  ;;  %v347_v34 = vld [vmem:[%s2172_s27] sm:$0xff]  ;;  %v358_v24 = vld [vmem:[%s2172_s27 + $0x58] sm:$0xff] }
  0xa4   : > { %v355_v9 = vld [vmem:[%s2172_s27 + $0x40] sm:$0xff] }
  0xa5   : > { %844 = vmatpush2.bf16.msra.mxu0 %v1660_v35 }
  0xa6   : > { %917 = vmatpush2.bf16.msra.mxu1 %v1661_v36  ;;  %845 = vmatprep.subr.bf16.mxu0 %v1662_v37 }
  0xa7   : > { %918 = vmatprep.subr.bf16.mxu1 %v1664_v38  ;;  %v348_v38 = vld [vmem:[%s2172_s27 + $0x8] sm:$0xff] }
  0xa9   : > { %846 = vmatpush2.bf16.msra.mxu0 %v1666_v39 }
  0xaa   : > { %919 = vmatpush2.bf16.msra.mxu1 %v1667_v40  ;;  %847 = vmatprep.subr.bf16.mxu0 %v1668_v41 }
  0xab   : > { %920 = vmatprep.subr.bf16.mxu1 %v1670_v42 }
  0xad   : > { %848 = vmatpush2.bf16.msra.mxu0 %v1672_v43  ;;  %v349_v43 = vld [vmem:[%s2172_s27 + $0x10] sm:$0xff] }
  0xae   : > { %921 = vmatpush2.bf16.msra.mxu1 %v1673_v44  ;;  %849 = vmatprep.subr.bf16.mxu0 %v1674_v45 }
  0xaf   : > { %922 = vmatprep.subr.bf16.mxu1 %v1676_v46 }
  0xb1   : > { %850 = vmatpush2.bf16.msra.mxu0 %v1678_v51 }
  0xb2   : > { %923 = vmatpush2.bf16.msra.mxu1 %v1679_v52  ;;  %851 = vmatprep.subr.bf16.mxu0 %v1680_v54 }
  0xb3   : > { %924 = vmatprep.subr.bf16.mxu1 %v1682_v55 }
  0xb5   : > { %852 = vmatpush2.bf16.msra.mxu0 %v1684_v57 }
  0xb6   : > { %925 = vmatpush2.bf16.msra.mxu1 %v1685_v58  ;;  %853 = vmatprep.subr.bf16.mxu0 %v1686_v59  ;;  %v352_v58 = vld [vmem:[%s2172_s27 + $0x28] sm:$0xff] }
  0xb7   : > { %926 = vmatprep.subr.bf16.mxu1 %v1688_v60 }
  0xb9   : > { %854 = vmatpush2.bf16.msra.mxu0 %v1690_v61 }
  0xba   : > { %927 = vmatpush2.bf16.msra.mxu1 %v1691_v62  ;;  %855 = vmatprep.subr.bf16.mxu0 %v1692_v63  ;;  %v353_v63 = vld [vmem:[%s2172_s27 + $0x30] sm:$0xff] }
  0xbb   : > { %928 = vmatprep.subr.bf16.mxu1 %v1694_v0 }
  0xbd   : > { %856 = vmatpush2.bf16.msra.mxu0 %v1696_v1 }
  0xbe   : > { %929 = vmatpush2.bf16.msra.mxu1 %v1697_v2  ;;  %857 = vmatprep.subr.bf16.mxu0 %v1698_v3 }
  0xbf   : > { %930 = vmatprep.subr.bf16.mxu1 %v1700_v4  ;;  %v354_v4 = vld [vmem:[%s2172_s27 + $0x38] sm:$0xff] }
  0xc1   : > { %858 = vmatpush2.bf16.msra.mxu0 %v1702_v5 }
  0xc2   : > { %931 = vmatpush2.bf16.msra.mxu1 %v1703_v6 }
  0xc4   : > { %860 = vmatmul.mubr.bf16.vlgmr.msra.gmra.mxu0 %v1391_v11 }
  0xc5   : > { %933 = vmatmul.mubr.bf16.vlgmr.msra.gmra.mxu1 %v1393_v12  ;;  %869 = vmatprep.mubr.bf16.mxu0 %v1396_v13 }
  0xc6   : > { %942 = vmatprep.mubr.bf16.mxu1 %v1398_v14  ;;  %v356_v14 = vld [vmem:[%s2172_s27 + $0x48] sm:$0xff] }
  0xcc   : > { %870 = vmatmul.mubr.bf16.gmra.mxu0 %v1395_v19  ;;  %v357_v19 = vld [vmem:[%s2172_s27 + $0x50] sm:$0xff] }
  0xcd   : > { %943 = vmatmul.mubr.bf16.gmra.mxu1 %v1397_v20  ;;  %879 = vmatprep.mubr.bf16.mxu0 %v1400_v21 }
  0xce   : > { %952 = vmatprep.mubr.bf16.mxu1 %v1402_v22 }
  0xd4   : > { %880 = vmatmul.mubr.bf16.gmra.mxu0 %v1399_v27 }
  0xd5   : > { %953 = vmatmul.mubr.bf16.gmra.mxu1 %v1401_v28  ;;  %889 = vmatprep.mubr.bf16.mxu0 %v1404_v29  ;;  %v359_v29 = vld [vmem:[%s2172_s27 + $0x60] sm:$0xff] }
  0xd6   : > { %962 = vmatprep.mubr.bf16.mxu1 %v1406_v30 }
  0xdc   : > { %890 = vmatmul.mubr.bf16.gmra.mxu0 %v1403_v31 }
  0xdd   : > { %963 = vmatmul.mubr.bf16.gmra.mxu1 %v1405_v32 }
 0x184   : > { %v861_v33 = vpop.f32.mrf.mxu0 }
 0x185   : > { %v934_v35 = vpop.f32.mrf.mxu1 }
 0x186   : > { %v935_v36 = vadd.f32 %v934_v35, %v861_v33  ;;  %v863_v37 = vpop.f32.mrf.mxu0 }
 0x187   : > { %v936_v39 = vpop.f32.mrf.mxu1 }
 0x188   : > { %v973_v40 = vadd.f32 %v935_v36, %v347_v34  ;;  %v937_v41 = vadd.f32 %v936_v39, %v863_v37  ;;  %v865_v42 = vpop.f32.mrf.mxu0  ;;  %v360_v34 = vld [vmem:[%s2172_s27 + $0x68] sm:$0xff]  ;;  %v361_v39 = vld [vmem:[%s2172_s27 + $0x70] sm:$0xff] }
 0x189   : > { %v938_v44 = vpop.f32.mrf.mxu1 }
 0x18a   : > { %989 = vst [vmem:[%s2172_s27] sm:$0xff] %v973_v40  ;;  %v974_v45 = vadd.f32 %v937_v41, %v348_v38  ;;  %v939_v46 = vadd.f32 %v938_v44, %v865_v42  ;;  %v867_v47 = vpop.f32.mrf.mxu0  ;;  %v362_v44 = vld [vmem:[%s2172_s27 + $0x78] sm:$0xff] }
 0x18b   : > { %v940_v49 = vpop.f32.mrf.mxu1 }
 0x18c   : > { %990 = vst [vmem:[%s2172_s27 + $0x8] sm:$0xff] %v974_v45  ;;  %v975_v50 = vadd.f32 %v939_v46, %v349_v43  ;;  %v941_v51 = vadd.f32 %v940_v49, %v867_v47  ;;  %v871_v52 = vpop.f32.mrf.mxu0 }
 0x18d   : > { %v944_v54 = vpop.f32.mrf.mxu1 }
 0x18e   : > { %991 = vst [vmem:[%s2172_s27 + $0x10] sm:$0xff] %v975_v50  ;;  %v976_v55 = vadd.f32 %v941_v51, %v350_v48  ;;  %v945_v56 = vadd.f32 %v944_v54, %v871_v52  ;;  %v873_v57 = vpop.f32.mrf.mxu0 }
 0x18f   : > { %v946_v59 = vpop.f32.mrf.mxu1 }
 0x190   : > { %992 = vst [vmem:[%s2172_s27 + $0x18] sm:$0xff] %v976_v55  ;;  %v977_v60 = vadd.f32 %v945_v56, %v351_v53  ;;  %v947_v61 = vadd.f32 %v946_v59, %v873_v57  ;;  %v875_v62 = vpop.f32.mrf.mxu0 }
 0x191   : > { %v948_v0 = vpop.f32.mrf.mxu1 }
 0x192   : > { %993 = vst [vmem:[%s2172_s27 + $0x20] sm:$0xff] %v977_v60  ;;  %v978_v1 = vadd.f32 %v947_v61, %v352_v58  ;;  %v949_v2 = vadd.f32 %v948_v0, %v875_v62  ;;  %v877_v3 = vpop.f32.mrf.mxu0 }
 0x193   : > { %v950_v5 = vpop.f32.mrf.mxu1 }
 0x194   : > { %994 = vst [vmem:[%s2172_s27 + $0x28] sm:$0xff] %v978_v1  ;;  %v979_v6 = vadd.f32 %v949_v2, %v353_v63  ;;  %v951_v7 = vadd.f32 %v950_v5, %v877_v3  ;;  %v881_v8 = vpop.f32.mrf.mxu0 }
 0x195   : > { %v954_v10 = vpop.f32.mrf.mxu1 }
 0x196   : > { %995 = vst [vmem:[%s2172_s27 + $0x30] sm:$0xff] %v979_v6  ;;  %v980_v11 = vadd.f32 %v951_v7, %v354_v4  ;;  %v955_v12 = vadd.f32 %v954_v10, %v881_v8  ;;  %v883_v13 = vpop.f32.mrf.mxu0 }
 0x197   : > { %v956_v15 = vpop.f32.mrf.mxu1 }
 0x198   : > { %996 = vst [vmem:[%s2172_s27 + $0x38] sm:$0xff] %v980_v11  ;;  %v981_v16 = vadd.f32 %v955_v12, %v355_v9  ;;  %v957_v17 = vadd.f32 %v956_v15, %v883_v13  ;;  %v885_v18 = vpop.f32.mrf.mxu0 }
 0x199   : > { %v958_v20 = vpop.f32.mrf.mxu1 }
 0x19a   : > { %997 = vst [vmem:[%s2172_s27 + $0x40] sm:$0xff] %v981_v16  ;;  %v982_v21 = vadd.f32 %v957_v17, %v356_v14  ;;  %v959_v22 = vadd.f32 %v958_v20, %v885_v18  ;;  %v887_v23 = vpop.f32.mrf.mxu0 }
 0x19b   : > { %v960_v25 = vpop.f32.mrf.mxu1 }
 0x19c   : > { %998 = vst [vmem:[%s2172_s27 + $0x48] sm:$0xff] %v982_v21  ;;  %v983_v26 = vadd.f32 %v959_v22, %v357_v19  ;;  %v961_v27 = vadd.f32 %v960_v25, %v887_v23  ;;  %v891_v28 = vpop.f32.mrf.mxu0 }
 0x19d   : > { %v964_v30 = vpop.f32.mrf.mxu1 }
 0x19e   : > { %999 = vst [vmem:[%s2172_s27 + $0x50] sm:$0xff] %v983_v26  ;;  %v984_v31 = vadd.f32 %v961_v27, %v358_v24  ;;  %v965_v32 = vadd.f32 %v964_v30, %v891_v28  ;;  %v893_v33 = vpop.f32.mrf.mxu0 }
 0x19f   : > { %v966_v35 = vpop.f32.mrf.mxu1 }
 0x1a0   : > { %1000 = vst [vmem:[%s2172_s27 + $0x58] sm:$0xff] %v984_v31  ;;  %v985_v36 = vadd.f32 %v965_v32, %v359_v29  ;;  %v967_v37 = vadd.f32 %v966_v35, %v893_v33  ;;  %v895_v38 = vpop.f32.mrf.mxu0 }
 0x1a1   : > { %v968_v40 = vpop.f32.mrf.mxu1 }
 0x1a2   : > { %1001 = vst [vmem:[%s2172_s27 + $0x60] sm:$0xff] %v985_v36  ;;  %v986_v41 = vadd.f32 %v967_v37, %v360_v34  ;;  %v969_v42 = vadd.f32 %v968_v40, %v895_v38  ;;  %v897_v43 = vpop.f32.mrf.mxu0 }
 0x1a3   : > { %v970_v45 = vpop.f32.mrf.mxu1 }
 0x1a4   : > { %1002 = vst [vmem:[%s2172_s27 + $0x68] sm:$0xff] %v986_v41  ;;  %v987_v46 = vadd.f32 %v969_v42, %v361_v39  ;;  %v971_v47 = vadd.f32 %v970_v45, %v897_v43  ;;  %1008 = sbr.rel (%p1471_p11) target bundleno = 531 (0x213), region = 56 }
 0x1a6   : > { %1003 = vst [vmem:[%s2172_s27 + $0x70] sm:$0xff] %v987_v46  ;;  %v988_v48 = vadd.f32 %v971_v47, %v362_v44 }
 0x1a8   : > { %1004 = vst [vmem:[%s2172_s27 + $0x78] sm:$0xff] %v988_v48 }
 0x1a9   : > { %v1009_v49 = vld [vmem:[%s2172_s27] sm:$0xff]  ;;  %v1010_v50 = vld [vmem:[%s2172_s27 + $0x8] sm:$0xff]  ;;  %v1011_v51 = vld [vmem:[%s2172_s27 + $0x10] sm:$0xff] }
 0x1aa   : > { %v1012_v52 = vld [vmem:[%s2172_s27 + $0x18] sm:$0xff]  ;;  %v1013_v53 = vld [vmem:[%s2172_s27 + $0x20] sm:$0xff]  ;;  %v1014_v54 = vld [vmem:[%s2172_s27 + $0x28] sm:$0xff]  ;;  %v1025_v55 = vadd.f32 %v1011_v51, %v1009_v49 }
 0x1ab   : > { %v1015_v56 = vld [vmem:[%s2172_s27 + $0x30] sm:$0xff]  ;;  %v1038_v57 = vadd.f32 %v1012_v52, %v1010_v50  ;;  %v1016_v58 = vld [vmem:[%s2172_s27 + $0x38] sm:$0xff]  ;;  %v1017_v60 = vld [vmem:[%s2172_s27 + $0x40] sm:$0xff] }
 0x1ac   : > { %v1026_v59 = vadd.f32 %v1025_v55, %v1013_v53  ;;  %v1018_v62 = vld [vmem:[%s2172_s27 + $0x48] sm:$0xff]  ;;  %v1019_v0 = vld [vmem:[%s2172_s27 + $0x50] sm:$0xff]  ;;  %v1020_v2 = vld [vmem:[%s2172_s27 + $0x58] sm:$0xff] }
 0x1ad   : > { %v1039_v61 = vadd.f32 %v1038_v57, %v1014_v54  ;;  %v1021_v4 = vld [vmem:[%s2172_s27 + $0x60] sm:$0xff]  ;;  %v1022_v6 = vld [vmem:[%s2172_s27 + $0x68] sm:$0xff]  ;;  %v1023_v8 = vld [vmem:[%s2172_s27 + $0x70] sm:$0xff] }
 0x1ae   : > { %v1027_v63 = vadd.f32 %v1026_v59, %v1015_v56 }
 0x1af   : > { %v1040_v1 = vadd.f32 %v1039_v61, %v1016_v58  ;;  %v1024_v10 = vld [vmem:[%s2172_s27 + $0x78] sm:$0xff] }
 0x1b0   : > { %v1028_v3 = vadd.f32 %v1027_v63, %v1017_v60 }
 0x1b1   : > { %v1041_v5 = vadd.f32 %v1040_v1, %v1018_v62 }
 0x1b2   : > { %v1029_v7 = vadd.f32 %v1028_v3, %v1019_v0 }
 0x1b3   : > { %v1042_v9 = vadd.f32 %v1041_v5, %v1020_v2 }
 0x1b4   : > { %v1030_v11 = vadd.f32 %v1029_v7, %v1021_v4 }
 0x1b5   : > { %v1043_v12 = vadd.f32 %v1042_v9, %v1022_v6 }
 0x1b6   : > { %v1031_v13 = vadd.f32 %v1030_v11, %v1023_v8 }
 0x1b7   : > { %v1044_v14 = vadd.f32 %v1043_v12, %v1024_v10 }
 0x1b8   : > { %v1032_v15 = vrot.slane %v1031_v13, 4 }
 0x1b9   : > { %v1045_v16 = vrot.slane %v1044_v14, 4 }
 0x1ba   : > { %v1033_v17 = vadd.f32 %v1032_v15, %v1031_v13 }
 0x1bb   : > { %v1046_v18 = vadd.f32 %v1045_v16, %v1044_v14 }
 0x1bc   : > { %v1034_v19 = vrot.slane %v1033_v17, 2 }
 0x1bd   : > { %v1047_v20 = vrot.slane %v1046_v18, 2 }
 0x1be   : > { %v1035_v21 = vadd.f32 %v1034_v19, %v1033_v17 }
 0x1bf   : > { %v1048_v22 = vadd.f32 %v1047_v20, %v1046_v18 }
 0x1c0   : > { %v1036_v23 = vrot.slane %v1035_v21, 1 }
 0x1c1   : > { %v1049_v24 = vrot.slane %v1048_v22, 1 }
 0x1c2   : > { %v1037_v25 = vadd.f32 %v1036_v23, %v1035_v21 }
 0x1c3   : > { %v1050_v26 = vadd.f32 %v1049_v24, %v1048_v22 }
 0x1c4   : > { %v1052_v27 = vmul.f32 0.015625, %v1037_v25 }
 0x1c5   : > { %v1053_v28 = vmul.f32 0.015625, %v1050_v26 }
 0x1c6   : > { %v2323_v29 = vsub.f32 %v1009_v49, %v1052_v27  ;;  %v2325_v30 = vsub.f32 %v1011_v51, %v1052_v27  ;;  %v2331_v33 = vsub.f32 %v1013_v53, %v1052_v27  ;;  %v2335_v35 = vsub.f32 %v1015_v56, %v1052_v27 }
 0x1c7   : > { %v2327_v31 = vsub.f32 %v1010_v50, %v1053_v28  ;;  %v2329_v32 = vsub.f32 %v1012_v52, %v1053_v28  ;;  %v2333_v34 = vsub.f32 %v1014_v54, %v1053_v28  ;;  %v2337_v36 = vsub.f32 %v1016_v58, %v1053_v28 }
 0x1c8   : > { %v1070_v37 = vmul.f32 %v2323_v29, %v2323_v29  ;;  %v1072_v39 = vmul.f32 %v2325_v30, %v2325_v30  ;;  %v2347_v41 = vsub.f32 %v1017_v60, %v1052_v27  ;;  %v2349_v42 = vsub.f32 %v1018_v62, %v1053_v28 }
 0x1c9   : > { %v1071_v38 = vmul.f32 %v2327_v31, %v2327_v31  ;;  %v1073_v40 = vmul.f32 %v2329_v32, %v2329_v32  ;;  %v1074_v43 = vmul.f32 %v2331_v33, %v2331_v33  ;;  %v1075_v44 = vmul.f32 %v2333_v34, %v2333_v34 }
 0x1ca   : > { %v2355_v45 = vsub.f32 %v1019_v0, %v1052_v27  ;;  %v2357_v46 = vsub.f32 %v1020_v2, %v1053_v28  ;;  %v1076_v47 = vmul.f32 %v2335_v35, %v2335_v35  ;;  %v1077_v48 = vmul.f32 %v2337_v36, %v2337_v36 }
 0x1cb   : > { %v1086_v49 = vadd.f32 %v1072_v39, %v1070_v37  ;;  %v1099_v50 = vadd.f32 %v1073_v40, %v1071_v38  ;;  %v2363_v51 = vsub.f32 %v1021_v4, %v1052_v27  ;;  %v2365_v52 = vsub.f32 %v1022_v6, %v1053_v28 }
 0x1cc   : > { %v1078_v53 = vmul.f32 %v2347_v41, %v2347_v41  ;;  %v1079_v54 = vmul.f32 %v2349_v42, %v2349_v42  ;;  %v2371_v57 = vsub.f32 %v1023_v8, %v1052_v27  ;;  %v2373_v58 = vsub.f32 %v1024_v10, %v1053_v28 }
 0x1cd   : > { %v1087_v55 = vadd.f32 %v1086_v49, %v1074_v43  ;;  %v1100_v56 = vadd.f32 %v1099_v50, %v1075_v44  ;;  %v1080_v59 = vmul.f32 %v2355_v45, %v2355_v45  ;;  %v1081_v60 = vmul.f32 %v2357_v46, %v2357_v46  ;;  %v1114_v49 = vld [vmem:[%s2158_s13] sm:$0x3] }
 0x1ce   : > { %v1082_v63 = vmul.f32 %v2363_v51, %v2363_v51  ;;  %v1083_v0 = vmul.f32 %v2365_v52, %v2365_v52  ;;  %v1084_v3 = vmul.f32 %v2371_v57, %v2371_v57  ;;  %v1085_v4 = vmul.f32 %v2373_v58, %v2373_v58 }
 0x1cf   : > { %v1088_v61 = vadd.f32 %v1087_v55, %v1076_v47  ;;  %v1101_v62 = vadd.f32 %v1100_v56, %v1077_v48  ;;  %v1929_v27 = vmov 1966171168   ;;  %v1125_v37 = vlaneseq  ;;  %v1165_v55 = vld [vmem:[%s303_s26] sm:$0x3] }
 0x1d0   : > { %v1123_v28 = vunpack.c.l.s4 %v1929_v27 }
 0x1d1   : > { %v1089_v1 = vadd.f32 %v1088_v61, %v1078_v53  ;;  %v1102_v2 = vadd.f32 %v1101_v62, %v1079_v54  ;;  %v1126_v39 = vshrl.u32 %v1125_v37, 7 }
 0x1d2   : > { %v1124_v38 = vunpack.c.0.s8 %v1123_v28 }
 0x1d3   : > { %v1090_v5 = vadd.f32 %v1089_v1, %v1080_v59  ;;  %v1103_v6 = vadd.f32 %v1102_v2, %v1081_v60  ;;  %v1141_v53 = vsub.s32 0, %v1126_v39  ;;  %v1145_v54 = vsub.s32 1, %v1126_v39 }
 0x1d4   : > { %v1127_v43 = vsub.s32 %v1124_v38, %v1126_v39 }
 0x1d5   : > { %v1091_v7 = vadd.f32 %v1090_v5, %v1082_v63  ;;  %v1104_v8 = vadd.f32 %v1103_v6, %v1083_v0  ;;  %v1170_v60 = vrot.slane %v1165_v55, %v1141_v53  ;;  %v1174_v62 = vrot.slane %v1165_v55, %v1145_v54 }
 0x1d7   : > { %v1092_v9 = vadd.f32 %v1091_v7, %v1084_v3  ;;  %v1105_v10 = vadd.f32 %v1104_v8, %v1085_v4 }
 0x1d9   : > { %v1093_v11 = vrot.slane %v1092_v9, 4  ;;  %v1106_v12 = vrot.slane %v1105_v10, 4 }
 0x1db   : > { %v1094_v13 = vadd.f32 %v1093_v11, %v1092_v9  ;;  %v1107_v14 = vadd.f32 %v1106_v12, %v1105_v10 }
 0x1dd   : > { %v1095_v15 = vrot.slane %v1094_v13, 2  ;;  %v1108_v16 = vrot.slane %v1107_v14, 2 }
 0x1df   : > { %v1096_v17 = vadd.f32 %v1095_v15, %v1094_v13  ;;  %v1109_v18 = vadd.f32 %v1108_v16, %v1107_v14 }
 0x1e1   : > { %v1097_v19 = vrot.slane %v1096_v17, 1  ;;  %v1110_v20 = vrot.slane %v1109_v18, 1 }
 0x1e3   : > { %v1098_v21 = vadd.f32 %v1097_v19, %v1096_v17  ;;  %v1111_v22 = vadd.f32 %v1110_v20, %v1109_v18 }
 0x1e5   : > { %v1112_v23 = vmul.f32 0.015625, %v1098_v21  ;;  %v1113_v24 = vmul.f32 0.015625, %v1111_v22 }
 0x1e7   : > { %v1115_v25 = vadd.f32 1e-05, %v1112_v23  ;;  %v1116_v26 = vadd.f32 1e-05, %v1113_v24 }
 0x1e9   : > { %1704 = vrsqrt.f32 %v1115_v25 }
 0x1ea   : > { %1706 = vrsqrt.f32 %v1116_v26 }
 0x1f6   : > { %v1705_v40 = vpop.eup %1704 }
 0x1f7   : > { %v1707_v44 = vpop.eup %1706 }
 0x1f8   : > { %v1121_v47 = vcombine.low %v1705_v40, %v1707_v44 }
 0x1fa   : > { %v1128_v48 = vrot.slane %v1121_v47, %v1127_v43 }
 0x1fc   : > { %v1135_v50 = vrot.slane %v1128_v48, %v1127_v43 }
 0x1fe   : > { %v1137_v56 = vmul.f32 %v1135_v50, %v1114_v49 }
 0x200   : > { %v1142_v59 = vrot.slane %v1137_v56, %v1141_v53  ;;  %v1146_v61 = vrot.slane %v1137_v56, %v1145_v54 }
 0x202   : > { %v1149_v63 = vmul.f32 %v1142_v59, %v2323_v29  ;;  %v1150_v0 = vmul.f32 %v1146_v61, %v2327_v31  ;;  %v1151_v1 = vmul.f32 %v1142_v59, %v2325_v30  ;;  %v1152_v2 = vmul.f32 %v1146_v61, %v2329_v32 }
 0x203   : > { %v1153_v3 = vmul.f32 %v1142_v59, %v2331_v33  ;;  %v1154_v4 = vmul.f32 %v1146_v61, %v2333_v34  ;;  %v1155_v5 = vmul.f32 %v1142_v59, %v2335_v35  ;;  %v1156_v6 = vmul.f32 %v1146_v61, %v2337_v36 }
 0x204   : > { %v1177_v7 = vadd.f32 %v1170_v60, %v1149_v63  ;;  %v1178_v8 = vadd.f32 %v1174_v62, %v1150_v0  ;;  %v1179_v9 = vadd.f32 %v1170_v60, %v1151_v1  ;;  %v1180_v29 = vadd.f32 %v1174_v62, %v1152_v2 }
 0x205   : > { %v1181_v31 = vadd.f32 %v1170_v60, %v1153_v3  ;;  %v1182_v30 = vadd.f32 %v1174_v62, %v1154_v4  ;;  %v1183_v10 = vadd.f32 %v1170_v60, %v1155_v5  ;;  %v1184_v32 = vadd.f32 %v1174_v62, %v1156_v6 }
 0x206   : > { %v1193_v11 = vmax.f32 %v1177_v7, 0.0  ;;  %v1194_v33 = vmax.f32 %v1178_v8, 0.0  ;;  %v1195_v34 = vmax.f32 %v1179_v9, 0.0  ;;  %v1196_v35 = vmax.f32 %v1180_v29, 0.0 }
 0x207   : > { %v1197_v36 = vmax.f32 %v1181_v31, 0.0  ;;  %v1198_v12 = vmax.f32 %v1182_v30, 0.0  ;;  %v1199_v13 = vmax.f32 %v1183_v10, 0.0  ;;  %v1200_v14 = vmax.f32 %v1184_v32, 0.0 }
 0x208   : > { %1209 = vst [vmem:[%s2172_s27] sm:$0xff] %v1193_v11  ;;  %1210 = vst [vmem:[%s2172_s27 + $0x8] sm:$0xff] %v1194_v33  ;;  %v1157_v15 = vmul.f32 %v1142_v59, %v2347_v41  ;;  %v1158_v16 = vmul.f32 %v1146_v61, %v2349_v42  ;;  %v1159_v17 = vmul.f32 %v1142_v59, %v2355_v45 }
 0x209   : > { %1211 = vst [vmem:[%s2172_s27 + $0x10] sm:$0xff] %v1195_v34  ;;  %1212 = vst [vmem:[%s2172_s27 + $0x18] sm:$0xff] %v1196_v35  ;;  %v1160_v18 = vmul.f32 %v1146_v61, %v2357_v46  ;;  %v1161_v19 = vmul.f32 %v1142_v59, %v2363_v51  ;;  %v1162_v20 = vmul.f32 %v1146_v61, %v2365_v52 }
 0x20a   : > { %1213 = vst [vmem:[%s2172_s27 + $0x20] sm:$0xff] %v1197_v36  ;;  %1214 = vst [vmem:[%s2172_s27 + $0x28] sm:$0xff] %v1198_v12  ;;  %v1163_v21 = vmul.f32 %v1142_v59, %v2371_v57  ;;  %v1164_v22 = vmul.f32 %v1146_v61, %v2373_v58  ;;  %v1185_v23 = vadd.f32 %v1170_v60, %v1157_v15 }
 0x20b   : > { %1215 = vst [vmem:[%s2172_s27 + $0x30] sm:$0xff] %v1199_v13  ;;  %1216 = vst [vmem:[%s2172_s27 + $0x38] sm:$0xff] %v1200_v14  ;;  %v1186_v41 = vadd.f32 %v1174_v62, %v1158_v16  ;;  %v1187_v42 = vadd.f32 %v1170_v60, %v1159_v17  ;;  %v1188_v45 = vadd.f32 %v1174_v62, %v1160_v18 }
 0x20c   : > { %v1189_v46 = vadd.f32 %v1170_v60, %v1161_v19  ;;  %v1190_v24 = vadd.f32 %v1174_v62, %v1162_v20  ;;  %v1191_v25 = vadd.f32 %v1170_v60, %v1163_v21  ;;  %v1192_v51 = vadd.f32 %v1174_v62, %v1164_v22 }
 0x20d   : > { %v1201_v52 = vmax.f32 %v1185_v23, 0.0  ;;  %v1202_v57 = vmax.f32 %v1186_v41, 0.0  ;;  %v1203_v26 = vmax.f32 %v1187_v42, 0.0  ;;  %v1204_v58 = vmax.f32 %v1188_v45, 0.0 }
 0x20e   : > { %v1205_v27 = vmax.f32 %v1189_v46, 0.0  ;;  %v1206_v28 = vmax.f32 %v1190_v24, 0.0  ;;  %v1207_v37 = vmax.f32 %v1191_v25, 0.0  ;;  %v1208_v38 = vmax.f32 %v1192_v51, 0.0 }
 0x20f   : > { %1217 = vst [vmem:[%s2172_s27 + $0x40] sm:$0xff] %v1201_v52  ;;  %1218 = vst [vmem:[%s2172_s27 + $0x48] sm:$0xff] %v1202_v57 }
 0x210   : > { %1219 = vst [vmem:[%s2172_s27 + $0x50] sm:$0xff] %v1203_v26  ;;  %1220 = vst [vmem:[%s2172_s27 + $0x58] sm:$0xff] %v1204_v58 }
 0x211   : > { %1221 = vst [vmem:[%s2172_s27 + $0x60] sm:$0xff] %v1205_v27  ;;  %1222 = vst [vmem:[%s2172_s27 + $0x68] sm:$0xff] %v1206_v28 }
 0x212   : > { %1223 = vst [vmem:[%s2172_s27 + $0x70] sm:$0xff] %v1207_v37  ;;  %1224 = vst [vmem:[%s2172_s27 + $0x78] sm:$0xff] %v1208_v38 }
 0x213 PF: > { %s1479_s13 = sshll.u32 %s1906_s22, 8  ;;  %s2534_s28 = sld [smem:[#allocation19_spill]] }
 0x214   : > { %s1239_s26 = sshll.u32 %s2172_s27, 4  ;;  %s1226_s18 = scalar_lea.sflag [#allocation4], %s2155_s6  ;;  %s2432_s26 = int_to_ptr.vmem [resolvable:$true] %s1239_s26 }
 0x215   : > { %s1790_s7 = scalar_lea.vmem %s2432_s26, 2048  ;;  %p2535_p1 = scmp.ne.s32.totalorder %s2523_s4, 0 }
 0x216   : > { %p1791_p0 = scmp.ne.s32.totalorder %s2432_s26, %s1790_s7  ;;  %s1930_s0 = smov [#allocation8]  }
 0x217   : > { %s1794_s1 = sshll.u32 %s1930_s0, 4  ;;  %s1795_s1 = int_to_ptr.vmem [resolvable:$false] %s1794_s1 }
 0x218   : > { %p1792_p3 = pnand %p1791_p0, %p2535_p1  ;;  %s1796_s22 = scalar_lea.vmem %s1795_s1, 4096 }
 0x219   : > { %s2429_s30 = scalar_lea.hbm %s2534_s28, %s1479_s13  ;;  %p1797_p5 = scmp.lt.s32.totalorder %s2432_s26, %s1795_s1 }
 0x21a   : > { %p1793_p2 = pneg %p1792_p3  ;;  %p1798_p6 = scmp.lt.s32.totalorder %s1796_s22, %s1790_s7 }
 0x21c   : > { %p1799_p7 = por %p1798_p6, %p1797_p5 }
 0x21e   : > { %p1800_p13 = pnand %p1799_p7, %p1793_p2 }
 0x220   : > { %1803 = shalt.err (!%p1800_p13)
}
 0x221   : > { %s1804_s27 = scalar_lea.hbm %s2429_s30, 2048  ;;  %s1808_s12 = scalar_lea.hbm %s2534_s28, 4096 }
 0x222   : > { %p1805_p12 = scmp.ne.s32.totalorder %s2429_s30, %s1804_s27  ;;  %p1809_p4 = scmp.lt.s32.totalorder %s2429_s30, %s2534_s28 }
 0x223   : > { %p1810_p9 = scmp.lt.s32.totalorder %s1808_s12, %s1804_s27 }
 0x224   : > { %p1806_p10 = pnand %p1805_p12, %p2535_p1 }
 0x225   : > { %p1811_p11 = por %p1810_p9, %p1809_p4 }
 0x226   : > { %p1807_p8 = pneg %p1806_p10 }
 0x228   : > { %p1812_p0 = pnand %p1811_p11, %p1807_p8 }
 0x22a   : > { %1815 = shalt.err (!%p1812_p0)
}
 0x22b   : > { %s1931_s13 = smov 256   ;;  %s1932_s29 = smov 512  }
 0x22c   : > { %s1933_s9 = smov 16  }
 0x22d   : > { %1488 = dma.vmem_to_hbm [thread:$0]  (%p2535_p1), %s2432_s26, 2048, %s2429_s30, %s1226_s18, %s1931_s13, %s1932_s29, %s1933_s9  }
 0x22e PF: > { %p1508_p3 = scmp.ge.s32.totalorder %s1918_s25, 2  ;;  %s1254_s7 = sand.u32 1, %s1878_s15  }
 0x22f   : > { %p2536_p2 = scmp.ne.s32.totalorder %s2525_s21, 0  ;;  %s1255_s0 = scalar_lea.sflag [#allocation4], %s1254_s7 }
 0x231   : > { %p1502_p5 = pnand %p1508_p3, %p2536_p2 }
 0x233   : > { %p1503_p6 = pneg %p1502_p5 }
 0x235   : > { %1873 = dma.done.wait (%p1503_p6), %s1255_s0, 2048  }
 0x236   : > { %1875 = vsyncadd (%p1503_p6), %s1255_s0, 4294965248  ;;  %s21_s25 = sadd.s32 1, %s1918_s25   ;;  %s2537_s4 = sld [smem:[#allocation14_spill]] }
 0x237   : > { %p18_p7 = scmp.ge.s32.totalorder %s21_s25, 6   ;;  %s2538_s6 = sld [smem:[#allocation15_spill]] }
 0x238   : > { %s2539_s15 = smov %s1882_s16  ;;  %s2540_s16 = smov %s1886_s17 }
 0x239   : > { %s2541_s17 = smov %s2096_s8  ;;  %s2542_s18 = smov %s1894_s19 }
 0x23a   : > { %s2543_s19 = smov %s1898_s20  ;;  %s2544_s20 = smov %s2044_s14 }
 0x23b   : > { %s2545_s21 = smov %s1910_s23  ;;  %s2546_s22 = smov %s1914_s24 }
 0x23c   : > { %s2547_s23 = smov %s2537_s4  ;;  %20 = sbr.rel (!%p18_p7) target bundleno = 15 (0xf), region = 109 }
 0x23d   : > { %s2548_s24 = smov %s2538_s6 }
 0x241   :  { %1260 = vsyncpa [#allocation3], 1 }
 0x242   :  { %1262 = vsyncpa [#allocation3 + $0x1], 1 }
 0x243   :  { %1263 = vsyncpa [#allocation6], 1 }
 0x244   :  { %1265 = vsyncpa [#allocation6 + $0x1], 1 }
 0x245   :  { %1266 = vsyncpa [#allocation4], 1 }
 0x246   :  { %1268 = vsyncpa [#allocation4 + $0x1], 1 }

</bundles_post_ra>
